<compile_context>
chip_gen: v7x
topology: tpu7x:2x2x1
jax: 0.10.0
libtpu: 0.0.40
codegen_flags: <defaults>
</compile_context>

<pallas_src>
import math

import jax
import jax.numpy as jnp
from jax.experimental import pallas as pl
from jax.experimental.pallas import tpu as pltpu

HID1 = 128       # fc1 output width
HID2 = 64        # fc2 output width (logical)
HID2_PAD = 128   # lane-dense padded fc2 width used inside the kernel


def _round_up(x, m):
    return (x + m - 1) // m * m


def critic_kernel(x_ref, w1_ref, b1_ref, w2_ref, b2_ref, w3_ref, b3_ref,
                  out_ref):
    # Matmul operand dtype is whatever the (pre-cast, VMEM-resident) weights
    # carry; only the fresh activations are cast per step.
    mm_dt = w1_ref.dtype
    x = x_ref[...].astype(mm_dt)                                       # [TB, D]

    # fc1 -> relu: MXU matmul with f32 accumulation, bias/ReLU on the VPU.
    h1 = jnp.dot(x, w1_ref[...], preferred_element_type=jnp.float32)   # [TB, 128]
    h1 = jnp.maximum(h1 + b1_ref[...], 0.0)

    # fc2 -> relu (columns 64..127 of w2/b2 are zero padding).
    h2 = jnp.dot(h1.astype(mm_dt), w2_ref[...],
                 preferred_element_type=jnp.float32)                   # [TB, 128]
    h2 = jnp.maximum(h2 + b2_ref[...], 0.0)

    # fc3 (single output column): VPU multiply + XLU lane reduction instead of
    # a wasted N=1 MXU pass.  w3 is a zero-padded (1, 128) f32 lane row.
    v = jnp.sum(h2 * w3_ref[...], axis=-1, keepdims=True) + b3_ref[0, 0]  # [TB, 1]

    # Lane-dense writeback: [TB, 1] -> [1, TB] (XLU transpose; VPU/MXU have
    # slack here), written into the (num_blocks, TB) output slab.
    out_ref[...] = v.T.astype(out_ref.dtype)


def _choose_tb(batch, d, tb_max):
    """Pick a batch tile: multiple of 8, VMEM-budgeted, v7x-friendly."""
    bp8 = _round_up(max(batch, 1), 8)
    # Per-row VMEM: 2x double-buffered f32 input + ~3 width-128 f32 hidden
    # temporaries (h1, h2, fc2 result) + 2x double-buffered output row.
    per_row = 2 * d * 4 + 3 * HID2_PAD * 4 + 2 * 4
    budget = 8 << 20  # ~8 MiB: comfortable on v5e(16 MiB)/v6e(32)/v7x(32) scoped VMEM
    tb = min(tb_max, max(8, budget // per_row), bp8)
    # v7x has 2 TensorCores fed via the "parallel" grid axis: for big batches
    # keep at least ~4 grid steps instead of one monolithic tile.
    if bp8 >= 2048:
        tb = min(tb, _round_up(-(-bp8 // 4), 8))
    tb = max(8, (tb // 8) * 8)
    return tb


def critic_forward(state, packed_params, *, tb_max=2048):
    """state: [B, input_size] (f32 or bf16).  Returns value: [B, 1] f32."""
    w1, b1, w2p, b2p, w3p, b3 = packed_params
    B, D = state.shape

    tb = _choose_tb(B, D, tb_max)
    bp = _round_up(B, tb)
    if bp != B:
        state = jnp.pad(state, ((0, bp - B), (0, 0)))
    num_blocks = bp // tb

    # Constant index_map => block never changes => weights stay VMEM-resident
    # across grid steps (fetched once).
    resident = lambda a: pl.BlockSpec(a.shape, lambda i: (0,) * a.ndim)

    out = pl.pallas_call(
        critic_kernel,
        out_shape=jax.ShapeDtypeStruct((num_blocks, tb), jnp.float32),
        grid=(num_blocks,),
        in_specs=[
            pl.BlockSpec((tb, D), lambda i: (i, 0)),            # state tile
            resident(w1), resident(b1),                         # fc1
            resident(w2p), resident(b2p),                       # fc2 (padded)
            resident(w3p),                                      # fc3 weight row (f32)
            pl.BlockSpec(memory_space=pltpu.MemorySpace.SMEM),  # fc3 bias scalar
        ],
        out_specs=pl.BlockSpec((1, tb), lambda i: (i, 0)),      # lane-dense row
        compiler_params=pltpu.CompilerParams(
            dimension_semantics=("parallel",)),
    )(state, w1, b1, w2p, b2p, w3p, b3)

    # Row i*tb + j of the batch lives at out[i, j]; padded rows are sliced off.
    return out.reshape(bp, 1)[:B]


def init_params(key, input_size):
    """Mirrors nn.Linear init: U(-1/sqrt(fan_in), +1/sqrt(fan_in)).

    Weights stored as (in_features, out_features); biases as (1, out_features).
    """
    def linear(k, fan_in, fan_out):
        kw, kb = jax.random.split(k)
        bound = 1.0 / math.sqrt(fan_in)
        w = jax.random.uniform(kw, (fan_in, fan_out), jnp.float32, -bound, bound)
        b = jax.random.uniform(kb, (1, fan_out), jnp.float32, -bound, bound)
        return w, b

    k1, k2, k3 = jax.random.split(key, 3)
    w1, b1 = linear(k1, input_size, HID1)
    w2, b2 = linear(k2, HID1, HID2)
    w3, b3 = linear(k3, HID2, 1)
    return w1, b1, w2, b2, w3, b3


def pack_params(params, matmul_dtype=jnp.bfloat16):
    """One-time repack into the lane-dense layout the kernel expects.

    w1: (D, 128)   -> matmul_dtype (cast hoisted out of the per-step loop)
    w2: (128, 64)  -> (128, 128) zero-padded columns, matmul_dtype
    b1/b2: f32, b2 zero-padded to (1, 128)        (bias add happens in f32)
    w3: (64, 1)    -> (1, 128) f32 lane row, zero-padded  (VPU/XLU path)
    b3: (1, 1)     unchanged (routed through SMEM)
    """
    w1, b1, w2, b2, w3, b3 = params
    w1p = w1.astype(matmul_dtype)
    w2p = (jnp.zeros((HID1, HID2_PAD), matmul_dtype)
           .at[:, :HID2].set(w2.astype(matmul_dtype)))
    b2p = jnp.zeros((1, HID2_PAD), jnp.float32).at[:, :HID2].set(b2)
    w3p = jnp.zeros((1, HID2_PAD), jnp.float32).at[0, :HID2].set(w3[:, 0])
    return w1p, b1, w2p, b2p, w3p, b3


def reference_forward(state, params):
    """Pure-JAX reference with the PyTorch module's semantics (f32)."""
    w1, b1, w2, b2, w3, b3 = params
    x = jnp.maximum(state @ w1 + b1, 0.0)
    x = jnp.maximum(x @ w2 + b2, 0.0)
    return x @ w3 + b3


if __name__ == "__main__":
    key = jax.random.PRNGKey(0)
    key, k_state, k_params, k_big = jax.random.split(key, 4)

    batch = 8
    input_size = 32
    state = jax.random.normal(k_state, (batch, input_size), jnp.float32)
    params = init_params(k_params, input_size)

    packed_f32 = pack_params(params, matmul_dtype=jnp.float32)   # exact numerics
    packed_bf16 = pack_params(params)                            # throughput path

    # 1) Small batch, f32 path (single grid step): exact vs reference.
    value = jax.block_until_ready(critic_forward(state, packed_f32))
    ref = reference_forward(state, params)
    assert value.shape == (batch, 1), value.shape
    assert jnp.allclose(value, ref, atol=1e-5, rtol=1e-5), "mismatch vs reference"

    # 2) Larger, non-multiple batch, f32 path: exercises batch padding.
    big = jax.random.normal(k_big, (300, input_size), jnp.float32)
    ref_big = reference_forward(big, params)
    value_big = jax.block_until_ready(critic_forward(big, packed_f32))
    assert value_big.shape == (300, 1), value_big.shape
    assert jnp.allclose(value_big, ref_big, atol=1e-5, rtol=1e-5), "mismatch (big)"

    # 3) Force a multi-step parallel grid (tb_max=128 -> 3 blocks) to exercise
    #    the lane-dense (num_blocks, tb) output indexing + reshape.
    value_multi = jax.block_until_ready(
        critic_forward(big, packed_f32, tb_max=128))
    assert jnp.allclose(value_multi, ref_big, atol=1e-5, rtol=1e-5), "mismatch (multi-block)"

    # 4) Default bf16-operand path: f32 accumulation, looser tolerance.
    value_bf16 = jax.block_until_ready(critic_forward(big, packed_bf16))
    rel_err = jnp.max(jnp.abs(value_bf16 - ref_big) / (1.0 + jnp.abs(ref_big)))
    assert rel_err < 5e-2, f"bf16 path error too large: {rel_err}"

    print("KERNEL_OK")
</pallas_src>

<mosaic_0001>
module attributes {stable_mosaic.version = 11 : i64} {
  func.func @critic_kernel(%arg0: i32, %arg1: memref<8x32xf32, #tpu.memory_space<vmem>>, %arg2: memref<32x128xf32, #tpu.memory_space<vmem>>, %arg3: memref<1x128xf32, #tpu.memory_space<vmem>>, %arg4: memref<128x128xf32, #tpu.memory_space<vmem>>, %arg5: memref<1x128xf32, #tpu.memory_space<vmem>>, %arg6: memref<1x128xf32, #tpu.memory_space<vmem>>, %arg7: memref<1x1xf32, #tpu.memory_space<smem>>, %arg8: memref<1x8xf32, #tpu.memory_space<vmem>>) attributes {dimension_semantics = [#tpu.dimension_semantics<parallel>], iteration_bounds = array<i64: 1>, scalar_prefetch = 0 : i64, scratch_operands = 0 : i64, tpu.core_type = #tpu.core_type<tc>, window_params = [{transform_indices = @transform_0, window_bounds = array<i64: 8, 32>}, {pipeline_mode = #tpu.pipeline_mode<synchronous>, transform_indices = @transform_1, window_bounds = array<i64: 32, 128>}, {pipeline_mode = #tpu.pipeline_mode<synchronous>, transform_indices = @transform_2, window_bounds = array<i64: 1, 128>}, {pipeline_mode = #tpu.pipeline_mode<synchronous>, transform_indices = @transform_3, window_bounds = array<i64: 128, 128>}, {pipeline_mode = #tpu.pipeline_mode<synchronous>, transform_indices = @transform_4, window_bounds = array<i64: 1, 128>}, {pipeline_mode = #tpu.pipeline_mode<synchronous>, transform_indices = @transform_5, window_bounds = array<i64: 1, 128>}, {transform_indices = @transform_6, window_bounds = array<i64: 1, 1>}, {transform_indices = @transform_7, window_bounds = array<i64: 1, 8>}]} {
    %c0 = arith.constant 0 : index
    %c0_0 = arith.constant 0 : index
    %0 = vector.load %arg1[%c0, %c0_0] : memref<8x32xf32, #tpu.memory_space<vmem>>, vector<8x32xf32>
    %c0_1 = arith.constant 0 : index
    %c0_2 = arith.constant 0 : index
    %1 = vector.load %arg2[%c0_1, %c0_2] : memref<32x128xf32, #tpu.memory_space<vmem>>, vector<32x128xf32>
    %cst = arith.constant dense<0.000000e+00> : vector<8x128xf32>
    %2 = tpu.matmul %0, %1, %cst {dimension_numbers = #tpu.dot_dimension_numbers<[1], [0], [0], [1], [0, 0, 1, 1], [], []>} : vector<8x32xf32>, vector<32x128xf32>, vector<8x128xf32> -> vector<8x128xf32>
    %c0_3 = arith.constant 0 : index
    %c0_4 = arith.constant 0 : index
    %3 = vector.load %arg3[%c0_3, %c0_4] : memref<1x128xf32, #tpu.memory_space<vmem>>, vector<1x128xf32>
    %4 = vector.broadcast %3 : vector<1x128xf32> to vector<8x128xf32>
    %5 = arith.addf %2, %4 : vector<8x128xf32>
    %cst_5 = arith.constant 0.000000e+00 : f32
    %6 = vector.broadcast %cst_5 : f32 to vector<8x128xf32>
    %7 = arith.maximumf %5, %6 : vector<8x128xf32>
    %c0_6 = arith.constant 0 : index
    %c0_7 = arith.constant 0 : index
    %8 = vector.load %arg4[%c0_6, %c0_7] : memref<128x128xf32, #tpu.memory_space<vmem>>, vector<128x128xf32>
    %cst_8 = arith.constant dense<0.000000e+00> : vector<8x128xf32>
    %9 = tpu.matmul %7, %8, %cst_8 {dimension_numbers = #tpu.dot_dimension_numbers<[1], [0], [0], [1], [0, 0, 1, 1], [], []>} : vector<8x128xf32>, vector<128x128xf32>, vector<8x128xf32> -> vector<8x128xf32>
    %c0_9 = arith.constant 0 : index
    %c0_10 = arith.constant 0 : index
    %10 = vector.load %arg5[%c0_9, %c0_10] : memref<1x128xf32, #tpu.memory_space<vmem>>, vector<1x128xf32>
    %11 = vector.broadcast %10 : vector<1x128xf32> to vector<8x128xf32>
    %12 = arith.addf %9, %11 : vector<8x128xf32>
    %cst_11 = arith.constant 0.000000e+00 : f32
    %13 = vector.broadcast %cst_11 : f32 to vector<8x128xf32>
    %14 = arith.maximumf %12, %13 : vector<8x128xf32>
    %c0_12 = arith.constant 0 : index
    %c0_13 = arith.constant 0 : index
    %15 = vector.load %arg6[%c0_12, %c0_13] : memref<1x128xf32, #tpu.memory_space<vmem>>, vector<1x128xf32>
    %16 = vector.broadcast %15 : vector<1x128xf32> to vector<8x128xf32>
    %17 = arith.mulf %14, %16 : vector<8x128xf32>
    %cst_14 = arith.constant dense<0.000000e+00> : vector<8xf32>
    %18 = vector.multi_reduction <add>, %17, %cst_14 [1] : vector<8x128xf32> to vector<8xf32>
    %19 = vector.shape_cast %18 : vector<8xf32> to vector<8x1xf32>
    %c0_15 = arith.constant 0 : index
    %c0_16 = arith.constant 0 : index
    %20 = memref.load %arg7[%c0_15, %c0_16] : memref<1x1xf32, #tpu.memory_space<smem>>
    %21 = vector.broadcast %20 : f32 to vector<8x1xf32>
    %22 = arith.addf %19, %21 : vector<8x1xf32>
    %23 = tpu.transpose %22, [1, 0] : vector<8x1xf32> -> vector<1x8xf32>
    %c0_17 = arith.constant 0 : index
    %c0_18 = arith.constant 0 : index
    %24 = vector.load %arg8[%c0_17, %c0_18] : memref<1x8xf32, #tpu.memory_space<vmem>>, vector<1x8xf32>
    tpu.vector_store %arg8[%c0_17, %c0_18], %23 {strides = array<i32>} : memref<1x8xf32, #tpu.memory_space<vmem>>, vector<1x8xf32>,
    return
  }
  func.func @transform_0(%arg0: i32) -> (i32, i32) {
    %c0_i32 = arith.constant 0 : i32
    %c0_i32_0 = arith.constant 0 : i32
    return %arg0, %c0_i32 : i32, i32
  }
  func.func @transform_1(%arg0: i32) -> (i32, i32) {
    %c0_i32 = arith.constant 0 : i32
    %c0_i32_0 = arith.constant 0 : i32
    %c0_i32_1 = arith.constant 0 : i32
    return %c0_i32, %c0_i32_0 : i32, i32
  }
  func.func @transform_2(%arg0: i32) -> (i32, i32) {
    %c0_i32 = arith.constant 0 : i32
    %c0_i32_0 = arith.constant 0 : i32
    %c0_i32_1 = arith.constant 0 : i32
    return %c0_i32, %c0_i32_0 : i32, i32
  }
  func.func @transform_3(%arg0: i32) -> (i32, i32) {
    %c0_i32 = arith.constant 0 : i32
    %c0_i32_0 = arith.constant 0 : i32
    %c0_i32_1 = arith.constant 0 : i32
    return %c0_i32, %c0_i32_0 : i32, i32
  }
  func.func @transform_4(%arg0: i32) -> (i32, i32) {
    %c0_i32 = arith.constant 0 : i32
    %c0_i32_0 = arith.constant 0 : i32
    %c0_i32_1 = arith.constant 0 : i32
    return %c0_i32, %c0_i32_0 : i32, i32
  }
  func.func @transform_5(%arg0: i32) -> (i32, i32) {
    %c0_i32 = arith.constant 0 : i32
    %c0_i32_0 = arith.constant 0 : i32
    %c0_i32_1 = arith.constant 0 : i32
    return %c0_i32, %c0_i32_0 : i32, i32
  }
  func.func @transform_6(%arg0: i32) -> (i32, i32) {
    %c0_i32 = arith.constant 0 : i32
    %c0_i32_0 = arith.constant 0 : i32
    %c0_i32_1 = arith.constant 0 : i32
    return %c0_i32, %c0_i32_0 : i32, i32
  }
  func.func @transform_7(%arg0: i32) -> (i32, i32) {
    %c0_i32 = arith.constant 0 : i32
    %c0_i32_0 = arith.constant 0 : i32
    return %arg0, %c0_i32 : i32, i32
  }
}

</mosaic_0001>

<bundles_post_ra>
// kernel: tpu_custom_call.1
= control target key start
LH: loop header
LB: loop body
LE: loop exit
PB: predicated region body
PF: predicated region fallthrough
CT: control target
= control target key end

     0   :  { %13 = vsyncpa [#allocation4], 0  ;;  %s631_s0 = inlined_call_operand.hbm [shape: f32[8,32], index: 0, kind: input, shape index: {}]   ;;  %s632_s1 = inlined_call_operand.hbm [shape: f32[32,128], index: 1, kind: input, shape index: {}]   ;;  %s633_s2 = inlined_call_operand.vmem [shape: f32[1,128], index: 2, kind: input, shape index: {}]   ;;  %s634_s3 = inlined_call_operand.hbm [shape: f32[128,128], index: 3, kind: input, shape index: {}]   ;;  %s635_s4 = inlined_call_operand.vmem [shape: f32[1,128], index: 4, kind: input, shape index: {}]   ;;  %s636_s5 = inlined_call_operand.vmem [shape: f32[1,128], index: 5, kind: input, shape index: {}]   ;;  %s637_s6 = inlined_call_operand.<no memory space> [shape: f32[1,1], index: 6, kind: input, shape index: {}]   ;;  %s638_s7 = inlined_call_operand.hbm [shape: f32[1,8], index: 7, kind: output, shape index: {}]  }
   0x1   :  { %14 = vsyncpa [#allocation7], 0 }
   0x2   :  { %15 = vsyncpa [#allocation5], 0  ;;  %s516_s24 = smov [#allocation6]   ;;  %s422_s28 = scalar_lea.hbm %s632_s1, 512 }
   0x3   :  { %s31_s25 = sshll.u32 %s516_s24, 4  ;;  %p423_p0 = scmp.ne.s32.totalorder %s632_s1, %s422_s28  ;;  %s32_s25 = int_to_ptr.vmem [resolvable:$true] %s31_s25 }
   0x4   :  { %p426_p1 = scmp.lt.u32.totalorder %s422_s28, %s632_s1 }
   0x6   :  { %p428_p2 = pnand %p426_p1, %p423_p0 }
   0x8   :  { %431 = shalt.err (!%p428_p2)
}
   0x9   :  { %s432_s10 = scalar_lea.vmem %s32_s25, 512  ;;  %p437_p4 = scmp.lt.s32.totalorder %s32_s25, %s32_s25 }
   0xa   :  { %p433_p3 = scmp.ne.s32.totalorder %s32_s25, %s432_s10  ;;  %p438_p5 = scmp.lt.s32.totalorder %s432_s10, %s432_s10 }
   0xc   :  { %p439_p6 = por %p438_p5, %p437_p4 }
   0xe   :  { %p440_p7 = pnand %p439_p6, %p433_p3 }
  0x10   :  { %443 = shalt.err (!%p440_p7)
}
  0x11   :  { %s517_s11 = smov 128   ;;  %s518_s12 = smov 8  }
  0x12   :  { %37 = dma.hbm_to_vmem [thread:$0]  %s632_s1, 512, %s32_s25, [#allocation7], %s517_s11, %s517_s11, %s518_s12  }
  0x13   :  { %s519_s15 = smov [#allocation3]   ;;  %s520_s17 = smov [#allocation8]  }
  0x14   :  { %s22_s16 = sshll.u32 %s519_s15, 4  ;;  %s45_s18 = sshll.u32 %s520_s17, 4  ;;  %s23_s16 = int_to_ptr.vmem [resolvable:$true] %s22_s16  ;;  %s46_s18 = int_to_ptr.vmem [resolvable:$true] %s45_s18 }
  0x15   :  { %s444_s21 = scalar_lea.hbm %s631_s0, 128 }
  0x16   :  { %p445_p8 = scmp.ne.s32.totalorder %s631_s0, %s444_s21  ;;  %p448_p9 = scmp.lt.u32.totalorder %s444_s21, %s631_s0 }
  0x18   :  { %p450_p10 = pnand %p448_p9, %p445_p8 }
  0x1a   :  { %453 = shalt.err (!%p450_p10)
}
  0x1b   :  { %s454_s1 = scalar_lea.vmem %s23_s16, 128  ;;  %p459_p12 = scmp.lt.s32.totalorder %s23_s16, %s23_s16 }
  0x1c   :  { %p455_p11 = scmp.ne.s32.totalorder %s23_s16, %s454_s1  ;;  %p460_p13 = scmp.lt.s32.totalorder %s454_s1, %s454_s1 }
  0x1e   :  { %p461_p0 = por %p460_p13, %p459_p12 }
  0x20   :  { %p462_p1 = pnand %p461_p0, %p455_p11 }
  0x22   :  { %465 = shalt.err (!%p462_p1)
}
  0x23   :  { %25 = dma.hbm_to_vmem [thread:$0]  %s631_s0, 128, %s23_s16, [#allocation4]  }
  0x24   :  { %s466_s30 = scalar_lea.hbm %s634_s3, 2048 }
  0x25   :  { %p467_p2 = scmp.ne.s32.totalorder %s634_s3, %s466_s30  ;;  %p470_p3 = scmp.lt.u32.totalorder %s466_s30, %s634_s3 }
  0x27   :  { %p472_p4 = pnand %p470_p3, %p467_p2 }
  0x29   :  { %475 = shalt.err (!%p472_p4)
}
  0x2a   :  { %s476_s14 = scalar_lea.vmem %s46_s18, 2048  ;;  %p481_p6 = scmp.lt.s32.totalorder %s46_s18, %s46_s18 }
  0x2b   :  { %p477_p5 = scmp.ne.s32.totalorder %s46_s18, %s476_s14  ;;  %p482_p7 = scmp.lt.s32.totalorder %s476_s14, %s476_s14 }
  0x2d   :  { %p483_p8 = por %p482_p7, %p481_p6 }
  0x2f   :  { %p484_p9 = pnand %p483_p8, %p477_p5 }
  0x31   :  { %487 = shalt.err (!%p484_p9)
}
  0x32   :  { %51 = dma.hbm_to_vmem [thread:$0]  %s634_s3, 2048, %s46_s18, [#allocation7], %s517_s11, %s517_s11, %s518_s12  }
  0x33   :  { %510 = dma.done.wait [#allocation4], 128  }
  0x34   :  { %511 = vsyncadd [#allocation4], 4294967168 }
  0x35   :  { %512 = dma.done.wait [#allocation7], 2560  }
  0x36   :  { %513 = vsyncadd [#allocation7], 4294964736  ;;  %v521_v0 = vmov 0.0|0.0   ;;  %vm522_vm0 = vmmov 0   ;;  %v523_v1 = vmov 0.0   ;;  %v68_v2 = vld [vmem:[#allocation6] sm:$0xff]  ;;  %v259_v45 = vstv %s637_s6 }
  0x37   :  { %383 = vmatprep.subr.bf16.mxu0 %v521_v0  ;;  %345 = vmatprep.mubr.msk.f32.mxu0 %vm522_vm0, %v523_v1  ;;  %v69_v3 = vld [vmem:[#allocation6 + $0x8] sm:$0xff]  ;;  %v70_v4 = vld [vmem:[#allocation6 + $0x10] sm:$0xff]  ;;  %v71_v6 = vld [vmem:[#allocation6 + $0x18] sm:$0xff]  ;;  %vm79_vm1 = vcmask 261120   ;;  %s524_s20 = smov [#allocation9]   ;;  %vm293_vm2 = vcmask 57344  }
  0x38   :  { %389 = vmatprep.subr.bf16.mxu1 %v521_v0  ;;  %380 = vmatprep.mubr.msk.f32.mxu1 %vm522_vm0, %v523_v1  ;;  %v384_v5 = vpack.c.bf16 %v69_v3, %v68_v2  ;;  %v154_v7 = vld [vmem:[#allocation8] sm:$0xff]  ;;  %v155_v8 = vld [vmem:[#allocation8 + $0x8] sm:$0xff]  ;;  %v156_v9 = vld [vmem:[#allocation8 + $0x10] sm:$0xff]  ;;  %v387_v11 = vpack.c.bf16 %v71_v6, %v70_v4  ;;  %s301_s21 = sshll.u32 %s524_s20, 4  ;;  %s302_s21 = int_to_ptr.vmem [resolvable:$true] %s301_s21 }
  0x39   :  { %v157_v10 = vld [vmem:[#allocation8 + $0x18] sm:$0xff]  ;;  %v390_v12 = vpack.c.bf16 %v155_v8, %v154_v7  ;;  %v158_v14 = vld [vmem:[#allocation8 + $0x20] sm:$0xff]  ;;  %v159_v15 = vld [vmem:[#allocation8 + $0x28] sm:$0xff]  ;;  %s492_s22 = scalar_lea.vmem %s302_s21, 32  ;;  %p493_p11 = scmp.lt.s32.totalorder %s302_s21, %s302_s21 }
  0x3a   :  { %385 = vmatpush3.bf16.msra.mxu0 %v384_v5  ;;  %v393_v13 = vpack.c.bf16 %v157_v10, %v156_v9  ;;  %v67_v16 = vld [vmem:[#allocation3] sm:$0xff]  ;;  %v396_v17 = vpack.c.bf16 %v159_v15, %v158_v14  ;;  %v160_v18 = vld [vmem:[#allocation8 + $0x30] sm:$0xff]  ;;  %v162_v21 = vld [vmem:[#allocation8 + $0x40] sm:$0xff] }
  0x3b   :  { %386 = vmatprep.subr.bf16.mxu0 %v521_v0  ;;  %391 = vmatpush3.bf16.msra.mxu1 %v390_v12  ;;  %v161_v19 = vld [vmem:[#allocation8 + $0x38] sm:$0xff]  ;;  %v163_v22 = vld [vmem:[#allocation8 + $0x48] sm:$0xff]  ;;  %v164_v24 = vld [vmem:[#allocation8 + $0x50] sm:$0xff] }
  0x3c   :  { %392 = vmatprep.subr.bf16.mxu1 %v521_v0  ;;  %v399_v20 = vpack.c.bf16 %v161_v19, %v160_v18  ;;  %v402_v23 = vpack.c.bf16 %v163_v22, %v162_v21  ;;  %v165_v25 = vld [vmem:[#allocation8 + $0x58] sm:$0xff]  ;;  %v166_v27 = vld [vmem:[#allocation8 + $0x60] sm:$0xff]  ;;  %v167_v28 = vld [vmem:[#allocation8 + $0x68] sm:$0xff] }
  0x3d   :  { %v405_v26 = vpack.c.bf16 %v165_v25, %v164_v24  ;;  %v408_v29 = vpack.c.bf16 %v167_v28, %v166_v27  ;;  %v168_v30 = vld [vmem:[#allocation8 + $0x70] sm:$0xff]  ;;  %v169_v31 = vld [vmem:[#allocation8 + $0x78] sm:$0xff] }
  0x3e   :  { %388 = vmatpush3.bf16.msra.mxu0 %v387_v11  ;;  %v411_v32 = vpack.c.bf16 %v169_v31, %v168_v30  ;;  %v311_v33 = vld [vmem:[%s633_s2] ss:$0 sm:$0xff] }
  0x3f   :  { %394 = vmatpush3.bf16.msra.mxu1 %v393_v13  ;;  %v313_v38 = vld [vmem:[%s635_s4] ss:$0 sm:$0xff]  ;;  %s488_s4 = scalar_lea.vmem %s302_s21, 16 }
  0x40   :  { %395 = vmatprep.subr.bf16.mxu1 %v521_v0  ;;  %v314_v42 = vld [vmem:[%s636_s5] ss:$0 sm:$0xff]  ;;  %p489_p10 = scmp.ne.s32.totalorder %s302_s21, %s488_s4  ;;  %p494_p12 = scmp.lt.s32.totalorder %s492_s22, %s488_s4 }
  0x41   :  { %346 = vmatmul.mubr.msk.f32.vlgmr.msra.gmra.mrb[0].mxu0 %vm79_vm1, %v67_v16 }
  0x42   :  { %p495_p13 = por %p494_p12, %p493_p11 }
  0x43   :  { %397 = vmatpush3.bf16.msra.mxu1 %v396_v17 }
  0x44   :  { %398 = vmatprep.subr.bf16.mxu1 %v521_v0  ;;  %p496_p0 = pnand %p495_p13, %p489_p10 }
  0x47   :  { %400 = vmatpush3.bf16.msra.mxu1 %v399_v20 }
  0x48   :  { %401 = vmatprep.subr.bf16.mxu1 %v521_v0 }
  0x4b   :  { %403 = vmatpush3.bf16.msra.mxu1 %v402_v23 }
  0x4c   :  { %404 = vmatprep.subr.bf16.mxu1 %v521_v0 }
  0x4f   :  { %406 = vmatpush3.bf16.msra.mxu1 %v405_v26 }
  0x50   :  { %407 = vmatprep.subr.bf16.mxu1 %v521_v0 }
  0x53   :  { %409 = vmatpush3.bf16.msra.mxu1 %v408_v29 }
  0x54   :  { %410 = vmatprep.subr.bf16.mxu1 %v521_v0 }
  0x57   :  { %412 = vmatpush3.bf16.msra.mxu1 %v411_v32 }
 0x114   :  { %v149_v34 = vpop.f32.mrb[0].mxu0 }
 0x115   :  { %v150_v35 = vadd.f32 %v311_v33, %v149_v34  ;;  %v347_v36 = vpop.f32.mrb[1].mxu0 }
 0x117   :  { %v153_v37 = vmax.f32 %v150_v35, 0.0 }
 0x119   :  { %381 = vmatmul.mubr.f32.vlgmr.msra.gmra.mrb[0].mxu1 %v153_v37 }
 0x1ec   :  { %v243_v39 = vpop.f32.mrb[0].mxu1 }
 0x1ed   :  { %v244_v40 = vadd.f32 %v313_v38, %v243_v39  ;;  %v382_v41 = vpop.f32.mrb[1].mxu1 }
 0x1ef   :  { %v247_v43 = vmax.f32 %v244_v40, 0.0 }
 0x1f1   :  { %v255_v44 = vmul.f32 %v314_v42, %v247_v43 }
 0x1f3   :  { %256 = vadd.xlane.f32.xlu0 %v255_v44 }
 0x280   :  { %v257_v46 = vpop.xlane.xlu0 %256 }
 0x281   :  { %v260_v47 = vadd.f32 %v259_v45, %v257_v46 }
 0x283   :  { %261 = vxpose.xlu0.b32.start.end [1/1] (short) (narrow) %v260_v47, 8 }
 0x303   :  { %v277_v48 = vpop.trf.xlu0 }
 0x304   :  { %294 = vst.msk [vmem:[#allocation9] sm:$0x1] %vm293_vm2, %v277_v48 }
 0x305   :  { %499 = shalt.err (!%p496_p0)
}
 0x306   :  { %s500_s6 = scalar_lea.hbm %s638_s7, 16 }
 0x307   :  { %p501_p1 = scmp.ne.s32.totalorder %s638_s7, %s500_s6  ;;  %p504_p2 = scmp.lt.u32.totalorder %s500_s6, %s638_s7 }
 0x309   :  { %p506_p3 = pnand %p504_p2, %p501_p1 }
 0x30b   :  { %509 = shalt.err (!%p506_p3)
}
 0x30c   :  { %304 = dma.vmem_to_hbm [thread:$0]  %s302_s21, 16, %s638_s7, [#allocation5]  }
 0x30d   :  { %514 = dma.done.wait [#allocation5], 16  }
 0x30e   :  { %515 = vsyncadd [#allocation5], 4294967280 }
 0x30f   :  { %308 = vsyncpa [#allocation4], 1 }
 0x310   :  { %309 = vsyncpa [#allocation7], 1 }
 0x311   :  { %310 = vsyncpa [#allocation5], 1 }

</bundles_post_ra>
